<compile_context>
chip_gen: v5e
topology: v5e:2x2
jax: 0.10.0
libtpu: 0.0.40
codegen_flags: <defaults>
</compile_context>

<pallas_src>
import jax
import jax.numpy as jnp
from jax.experimental import pallas as pl
from jax.experimental.pallas import tpu as pltpu

_LANES = 128
# Widest lane widths to try (all multiples of 128); wider = fewer, bigger DMAs
# and unmasked full-width vector stores.
_W_CANDIDATES = (2048, 1024, 512, 256, 128)
# ~8 MiB of INPUT per block buffer. With input+output each double-buffered the
# pipeline holds ~4x that; we request that much scoped VMEM explicitly.
_DEFAULT_TARGET_BLOCK_BYTES = 8 * 1024 * 1024
# Below this element count pallas_call launch + single-step overhead dominates;
# XLA's fused exp is strictly better.
_DEFAULT_SMALL_N = 1 << 16


def _exp_kernel(x_ref, o_ref):
    # Elementwise exp on the current VMEM tile (EUP transcendental slot).
    # For integer inputs the int->float promotion is fused here (VPU cast).
    o_ref[...] = jnp.exp(x_ref[...].astype(o_ref.dtype))


def _pick_lane_width(n: int) -> int:
    """Widest multiple-of-128 lane width; exact divisor of n preferred."""
    for cand in _W_CANDIDATES:
        if n % cand == 0:
            return cand
    for cand in _W_CANDIDATES:
        if n >= cand:
            return cand
    return _LANES


def exp_pallas(x: jax.Array,
               *,
               target_block_bytes: int = _DEFAULT_TARGET_BLOCK_BYTES,
               small_n_threshold: int = _DEFAULT_SMALL_N) -> jax.Array:
    """Compute exp(x) elementwise with a Pallas TPU kernel (arbitrary shape)."""
    orig_shape = x.shape

    # dtype handling (mirrors torch.exp promotion semantics).
    if jnp.issubdtype(x.dtype, jnp.complexfloating):
        # TODO(synk): no Pallas TPU lowering for complex exp; plain JAX fallback.
        return jnp.exp(x)
    if jnp.issubdtype(x.dtype, jnp.floating):
        if jnp.dtype(x.dtype).itemsize > 4:   # f64 under x64: Mosaic can't lower
            x = x.astype(jnp.float32)
        out_dtype = x.dtype
    elif jnp.issubdtype(x.dtype, jnp.integer) and jnp.dtype(x.dtype).itemsize == 4:
        out_dtype = jnp.float32               # int32/uint32: cast fused in-kernel
    else:
        x = x.astype(jnp.float32)             # bool / sub-32-bit ints
        out_dtype = jnp.float32

    n = x.size
    if n == 0 or n <= small_n_threshold:
        # Tiny tensors: kernel launch overhead dominates, let XLA fuse it.
        return jnp.exp(x.astype(out_dtype))

    in_item = jnp.dtype(x.dtype).itemsize
    out_item = jnp.dtype(out_dtype).itemsize

    flat = x.reshape(-1)
    W = _pick_lane_width(n)
    n_main = (n // W) * W        # aligned prefix handled by the kernel
    n_tail = n - n_main          # <W leftover elements handled by plain jnp.exp
    if n_main == 0:
        return jnp.exp(x.astype(out_dtype))

    rows = n_main // W
    slab = (flat[:n_main] if n_tail else flat).reshape(rows, W)

    # Block rows: ~target_block_bytes of input per buffer, multiple of 8 sublanes.
    target_rows = max(8, (target_block_bytes // (W * in_item)) // 8 * 8)
    if rows <= target_rows:
        block_rows = rows        # single block: block == full dim is allowed
        num_blocks = 1
    else:
        block_rows = target_rows
        num_blocks = pl.cdiv(rows, block_rows)
        if num_blocks % 2 == 1:
            # Prefer an even grid so the "parallel" axis load-balances across
            # v7x's two TensorCores (no effect on single-TC v5e/v6e).
            alt_rows = max(8, pl.cdiv(pl.cdiv(rows, num_blocks + 1), 8) * 8)
            alt_blocks = pl.cdiv(rows, alt_rows)
            if alt_blocks % 2 == 0:
                block_rows, num_blocks = alt_rows, alt_blocks

    # Scoped VMEM: input + output, each double-buffered, plus headroom.
    # (~36 MiB at the 8 MiB default: over v5e's 16 MiB scoped default, under
    #  v7x's 64 MiB physical per-TC VMEM and v5e/v6e's 128 MiB.)
    vmem_limit = int(max(2 * block_rows * W * (in_item + out_item) + (4 << 20),
                         32 << 20))

    out_slab = pl.pallas_call(
        _exp_kernel,
        out_shape=jax.ShapeDtypeStruct((rows, W), out_dtype),
        grid_spec=pltpu.PrefetchScalarGridSpec(
            num_scalar_prefetch=0,
            grid=(num_blocks,),
            in_specs=[pl.BlockSpec((block_rows, W), lambda i: (i, 0))],
            out_specs=pl.BlockSpec((block_rows, W), lambda i: (i, 0)),
        ),
        compiler_params=pltpu.CompilerParams(
            dimension_semantics=("parallel",),
            vmem_limit_bytes=vmem_limit,
        ),
        cost_estimate=pl.CostEstimate(
            flops=0,
            transcendentals=n_main,
            bytes_accessed=n_main * (in_item + out_item),
        ),
    )(slab)

    out_flat = out_slab.reshape(-1)
    if n_tail:
        tail = jnp.exp(flat[n_main:].astype(out_dtype))
        out_flat = jnp.concatenate([out_flat, tail])
    return out_flat.reshape(orig_shape)


if __name__ == "__main__":
    key = jax.random.PRNGKey(0)

    # Module-consistent small NCHW input. Force the Pallas path (the default
    # small-input fast path would otherwise use plain jnp.exp here).
    x = jax.random.normal(key, (2, 4, 16, 16), dtype=jnp.float32)
    out = exp_pallas(x, small_n_threshold=0)
    jax.block_until_ready(out)
    ref = jnp.exp(x)
    assert out.shape == x.shape and out.dtype == x.dtype
    assert jnp.allclose(out, ref, rtol=1e-6, atol=1e-6)

    # Same input through the small-input fast path (default threshold).
    out_fast = exp_pallas(x)
    jax.block_until_ready(out_fast)
    assert jnp.allclose(out_fast, ref, rtol=1e-6, atol=1e-6)

    # Multi-block input with an even grid split (forced small block bytes).
    x1 = jax.random.normal(jax.random.PRNGKey(1), (2, 128, 1024), dtype=jnp.float32)
    out1 = exp_pallas(x1, target_block_bytes=64 * 2048 * 4, small_n_threshold=0)
    jax.block_until_ready(out1)
    assert jnp.allclose(out1, jnp.exp(x1), rtol=1e-6, atol=1e-6)

    # Ragged last grid block (rows % block_rows != 0) with a tiny forced block,
    # exercising Pallas boundary masking on the sublane axis.
    x2 = jax.random.normal(jax.random.PRNGKey(2), (17 * 128,), dtype=jnp.float32)
    out2 = exp_pallas(x2, target_block_bytes=8 * 128 * 4, small_n_threshold=0)
    jax.block_until_ready(out2)
    assert jnp.allclose(out2, jnp.exp(x2), rtol=1e-6, atol=1e-6)

    # Ragged element count (numel % 128 != 0): aligned prefix through the
    # kernel, <W tail via plain jnp.exp (no pad/slice HBM passes).
    x3 = jax.random.normal(jax.random.PRNGKey(3), (3 * 2048 + 37,), dtype=jnp.float32)
    out3 = exp_pallas(x3, small_n_threshold=0)
    jax.block_until_ready(out3)
    assert out3.shape == x3.shape
    assert jnp.allclose(out3, jnp.exp(x3), rtol=1e-6, atol=1e-6)

    # Tiny fully-ragged input (numel < 128) hits the plain-JAX guard.
    x4 = jax.random.normal(jax.random.PRNGKey(4), (3, 5, 7), dtype=jnp.float32)
    out4 = exp_pallas(x4, small_n_threshold=0)
    jax.block_until_ready(out4)
    assert jnp.allclose(out4, jnp.exp(x4), rtol=1e-6, atol=1e-6)

    # bf16 stays bf16 inside the kernel (half the HBM bytes on v6e/v7x).
    x5 = jax.random.normal(jax.random.PRNGKey(5), (4, 8, 32), dtype=jnp.bfloat16)
    out5 = exp_pallas(x5, small_n_threshold=0)
    jax.block_until_ready(out5)
    assert out5.dtype == jnp.bfloat16
    assert jnp.allclose(out5.astype(jnp.float32),
                        jnp.exp(x5.astype(jnp.float32)), rtol=2e-2, atol=2e-2)

    # int32 input: int->float32 promotion fused into the kernel.
    x6 = jax.random.randint(jax.random.PRNGKey(6), (4, 8, 64), 0, 5, dtype=jnp.int32)
    out6 = exp_pallas(x6, small_n_threshold=0)
    jax.block_until_ready(out6)
    assert out6.dtype == jnp.float32
    assert jnp.allclose(out6, jnp.exp(x6.astype(jnp.float32)), rtol=1e-6, atol=1e-6)

    print("KERNEL_OK")
</pallas_src>

<mosaic_0001>
module attributes {stable_mosaic.version = 11 : i64} {
  func.func @_exp_kernel(%arg0: i32, %arg1: memref<1x2048xf32, #tpu.memory_space<vmem>>, %arg2: memref<1x2048xf32, #tpu.memory_space<vmem>>) attributes {dimension_semantics = [#tpu.dimension_semantics<parallel>], iteration_bounds = array<i64: 1>, scalar_prefetch = 0 : i64, scratch_operands = 0 : i64, tpu.core_type = #tpu.core_type<tc>, window_params = [{transform_indices = @transform_0, window_bounds = array<i64: 1, 2048>}, {transform_indices = @transform_1, window_bounds = array<i64: 1, 2048>}]} {
    %c0 = arith.constant 0 : index
    %c0_0 = arith.constant 0 : index
    %0 = vector.load %arg1[%c0, %c0_0] : memref<1x2048xf32, #tpu.memory_space<vmem>>, vector<1x2048xf32>
    %1 = math.exp %0 : vector<1x2048xf32>
    %c0_1 = arith.constant 0 : index
    %c0_2 = arith.constant 0 : index
    %2 = vector.load %arg2[%c0_1, %c0_2] : memref<1x2048xf32, #tpu.memory_space<vmem>>, vector<1x2048xf32>
    tpu.vector_store %arg2[%c0_1, %c0_2], %1 {strides = array<i32>} : memref<1x2048xf32, #tpu.memory_space<vmem>>, vector<1x2048xf32>,
    return
  }
  func.func @transform_0(%arg0: i32) -> (i32, i32) {
    %c0_i32 = arith.constant 0 : i32
    %c0_i32_0 = arith.constant 0 : i32
    return %arg0, %c0_i32 : i32, i32
  }
  func.func @transform_1(%arg0: i32) -> (i32, i32) {
    %c0_i32 = arith.constant 0 : i32
    %c0_i32_0 = arith.constant 0 : i32
    return %arg0, %c0_i32 : i32, i32
  }
}

</mosaic_0001>

<bundles_post_ra>
// kernel: tpu_custom_call.1
= control target key start
LH: loop header
LB: loop body
LE: loop exit
PB: predicated region body
PF: predicated region fallthrough
CT: control target
= control target key end

     0   :  { %6 = vsyncpa [#allocation3], 0  ;;  %s124_s0 = inlined_call_operand.hbm [shape: f32[1,2048], index: 0, kind: input, shape index: {}]   ;;  %s125_s1 = inlined_call_operand.hbm [shape: f32[1,2048], index: 1, kind: output, shape index: {}]  }
   0x1   :  { %7 = vsyncpa [#allocation4], 0  ;;  %s13_s8 = sshll.u32 %s124_s0, 4  ;;  %s106_s9 = smov [#allocation2]   ;;  %s14_s8 = int_to_ptr.hbm [resolvable:$true] %s13_s8 }
   0x2   :  { %s15_s10 = sshll.u32 %s106_s9, 4  ;;  %s16_s10 = int_to_ptr.vmem [resolvable:$true] %s15_s10 }
   0x3   :  { %18 = dma.hbm_to_vmem [thread:$0]  %s14_s8, 256, %s16_s10, [#allocation3]  }
   0x4   :  { %102 = dma.done.wait [#allocation3], 256  }
   0x5   :  { %103 = vsyncadd [#allocation3], 4294967040  ;;  %v23_v0 = vld [vmem:[#allocation2] sm:$0xff]  ;;  %v24_v1 = vld [vmem:[#allocation2 + $0x8] sm:$0xff]  ;;  %s107_s11 = smov [#allocation5]   ;;  %s38_s15 = sshll.u32 %s125_s1, 4  ;;  %s39_s15 = int_to_ptr.hbm [resolvable:$true] %s38_s15 }
   0x6   :  { %v25_v2 = vmul.f32 1.442695, %v23_v0  ;;  %v27_v3 = vmul.f32 1.442695, %v24_v1  ;;  %s36_s12 = sshll.u32 %s107_s11, 4  ;;  %s37_s12 = int_to_ptr.vmem [resolvable:$true] %s36_s12 }
   0x8   :  { %50 = vpow2.f32 %v25_v2 }
   0x9   :  { %52 = vpow2.f32 %v27_v3 }
   0xe   :  { %v51_v4 = vpop.eup %50 }
   0xf   :  { %v53_v5 = vpop.eup %52  ;;  %29 = vst [vmem:[#allocation5] sm:$0xff] %v51_v4 }
  0x10   :  { %30 = vst [vmem:[#allocation5 + $0x8] sm:$0xff] %v53_v5 }
  0x11   :  { %41 = dma.vmem_to_hbm [thread:$0]  %s37_s12, 256, %s39_s15, [#allocation4]  }
  0x12   :  { %104 = dma.done.wait [#allocation4], 256  }
  0x13   :  { %105 = vsyncadd [#allocation4], 4294967040 }
  0x14   :  { %46 = vsyncpa [#allocation3], 1 }
  0x15   :  { %47 = vsyncpa [#allocation4], 1 }

</bundles_post_ra>
